<compile_context>
chip_gen: v5e
topology: v5e:2x2
jax: 0.10.0
libtpu: 0.0.40
codegen_flags: <defaults>
</compile_context>

<pallas_src>
import functools

import jax
import jax.numpy as jnp
from jax.experimental import pallas as pl
from jax.experimental.pallas import tpu as pltpu


def _round_up(a, b):
    return (a + b - 1) // b * b


def _dice_stats_kernel(inp_ref, tgt_ref, out_ref, *, num_classes, cls_pad):
    # inp_ref : (1, C, TR, 128)  logits tile (one batch row, TR*128 spatial elems)
    # tgt_ref : (1, 1, TR, 128)  int32 class labels tile
    # out_ref : (1, 3, CP, 128)  f32 lane-partial sums [inter, tgt_count, pred_count],
    #                            resident across the spatial grid axis (accumulator).
    n = pl.program_id(1)

    @pl.when(n == 0)
    def _init():
        out_ref[...] = jnp.zeros_like(out_ref)

    C = num_classes
    CP = cls_pad
    tr = tgt_ref.shape[2]
    lane = tgt_ref.shape[3]

    t = tgt_ref[0, 0]                                   # (TR, 128) int32

    # Running argmax over channels. Strict '>' keeps the first maximum, matching
    # torch.max / jnp.argmax tie behaviour. Channel planes are loaded one at a
    # time from VMEM to keep vreg pressure low. C is small -> static unroll.
    # (For very large C this could become a lax.fori_loop(..., unroll=True).)
    best_val = inp_ref[0, 0]                            # (TR, 128)
    best_idx = jnp.zeros((tr, lane), dtype=jnp.int32)
    for c in range(1, C):
        v = inp_ref[0, c]
        take = v > best_val
        best_val = jnp.where(take, v, best_val)
        best_idx = jnp.where(take, jnp.int32(c), best_idx)

    # One-hot planes for classes 1..CP (planes beyond C-1 are all zero and get
    # sliced off in the wrapper). Everything stays dense (CP, TR, 128).
    cls = jax.lax.broadcasted_iota(jnp.int32, (CP, tr, lane), 0) + 1
    tgt_oh = (t[None, :, :] == cls).astype(jnp.float32)         # (CP, TR, 128)
    prd_oh = (best_idx[None, :, :] == cls).astype(jnp.float32)  # (CP, TR, 128)

    # Sublane-reduce each class plane; keep the 128 lanes unreduced so the
    # accumulate/store is a dense (CP, 128) slab (no masked narrow stores).
    out_ref[0, 0] += jnp.sum(tgt_oh * prd_oh, axis=1)   # intersection
    out_ref[0, 1] += jnp.sum(tgt_oh, axis=1)            # |target == c|
    out_ref[0, 2] += jnp.sum(prd_oh, axis=1)            # |pred   == c|


def dice_forward(inputs, target, eps=1e-8, ifaverage=True):
    """Equivalent of Dice.forward(input, target) from the PyTorch module."""
    B, C = int(inputs.shape[0]), int(inputs.shape[1])
    N = 1
    for s in inputs.shape[2:]:
        N *= int(s)

    # Keep logits narrow (bf16 stays bf16); only promote unsupported dtypes.
    if inputs.dtype not in (jnp.float32, jnp.bfloat16):
        inputs = inputs.astype(jnp.float32)
    inp = inputs.reshape(B, C, N)
    tgt = target.reshape(B, N).astype(jnp.int32)

    LANE, SUB = 128, 8
    rows = -(-N // LANE)
    # Cap the logits tile at ~4 MiB so (2 inputs x 2 pipeline buffers) plus the
    # one-hot temporaries fit comfortably in VMEM on every generation
    # (including v7x's 64 MiB).
    bytes_per_row = C * LANE * inp.dtype.itemsize
    tr_cap = max(SUB, ((4 << 20) // bytes_per_row) // SUB * SUB)
    TR = min(512, _round_up(rows, SUB), tr_cap)
    rows_pad = _round_up(rows, TR)
    N_pad = rows_pad * LANE
    grid_n = rows_pad // TR

    if N_pad != N:
        # Zero padding: padded logits tie -> argmax = class 0, padded labels = 0,
        # so the tail contributes nothing to classes 1..C-1.
        inp = jnp.pad(inp, ((0, 0), (0, 0), (0, N_pad - N)))
        tgt = jnp.pad(tgt, ((0, 0), (0, N_pad - N)))
    inp4 = inp.reshape(B, C, rows_pad, LANE)
    tgt4 = tgt.reshape(B, 1, rows_pad, LANE)

    CP = max(SUB, _round_up(C - 1, SUB))  # class axis padded to a sublane multiple

    stats = pl.pallas_call(
        functools.partial(_dice_stats_kernel, num_classes=C, cls_pad=CP),
        out_shape=jax.ShapeDtypeStruct((B, 3, CP, LANE), jnp.float32),
        grid=(B, grid_n),
        in_specs=[
            pl.BlockSpec((1, C, TR, LANE), lambda b, n: (b, 0, n, 0)),  # logits
            pl.BlockSpec((1, 1, TR, LANE), lambda b, n: (b, 0, n, 0)),  # labels
        ],
        out_specs=pl.BlockSpec((1, 3, CP, LANE), lambda b, n: (b, 0, 0, 0)),
        compiler_params=pltpu.CompilerParams(
            dimension_semantics=("parallel", "arbitrary"),
            vmem_limit_bytes=48 * 1024 * 1024,
        ),
    )(inp4, tgt4)

    # Tiny finalization in plain JAX: lane-reduce the partial sums and form dice.
    sums = jnp.sum(stats, axis=-1)                 # (B, 3, CP), exact integer counts
    inter = sums[:, 0, :C - 1]
    tsum = sums[:, 1, :C - 1]
    psum = sums[:, 2, :C - 1]
    dice = (2.0 * inter + eps) / (tsum + psum + eps)   # (B, C-1)

    if ifaverage:
        diceout = jnp.mean(dice, axis=0)                    # (C-1,)
        diceout = jnp.mean(diceout, axis=0, keepdims=True)  # (1,)
    else:
        diceout = dice
    return diceout


def dice_forward_ref(inputs, target, eps=1e-8, ifaverage=True):
    """Pure-JAX reference mirroring the PyTorch loops (for correctness check)."""
    B, C = int(inputs.shape[0]), int(inputs.shape[1])
    x = inputs.reshape(B, C, -1).astype(jnp.float32)
    t = target.reshape(B, -1)
    pred = jnp.argmax(x, axis=1)
    cols = []
    for idx in range(1, C):
        ti = (t == idx).astype(jnp.float32)
        pi = (pred == idx).astype(jnp.float32)
        inter = jnp.sum(ti * pi, axis=1)
        union = jnp.sum(ti, axis=1) + jnp.sum(pi, axis=1)
        cols.append((2.0 * inter + eps) / (union + eps))
    dice = jnp.stack(cols, axis=1)
    if ifaverage:
        return jnp.mean(jnp.mean(dice, axis=0), axis=0, keepdims=True)
    return dice


if __name__ == "__main__":
    key = jax.random.PRNGKey(0)
    k1, k2 = jax.random.split(key)

    B, C, H, W = 2, 4, 16, 16
    x = jax.random.normal(k1, (B, C, H, W), dtype=jnp.float32)     # logits
    t = jax.random.randint(k2, (B, H, W), 0, C, dtype=jnp.int32)   # labels

    out = jax.block_until_ready(dice_forward(x, t))
    ref = dice_forward_ref(x, t)
    assert out.shape == (1,), out.shape
    assert out.dtype == jnp.float32
    assert jnp.allclose(out, ref, rtol=1e-6, atol=1e-6), (out, ref)

    out2 = jax.block_until_ready(dice_forward(x, t, ifaverage=False))
    ref2 = dice_forward_ref(x, t, ifaverage=False)
    assert out2.shape == (B, C - 1)
    assert jnp.allclose(out2, ref2, rtol=1e-6, atol=1e-6), (out2, ref2)

    # TODO(synk): backward() in the PyTorch module just raises (dice argmax is
    # non-differentiable); no gradient kernel is provided by design.
    print("KERNEL_OK")
</pallas_src>

<mosaic_0001>
module attributes {stable_mosaic.version = 11 : i64} {
  func.func @_dice_stats_kernel(%arg0: i32, %arg1: i32, %arg2: memref<1x4x8x128xf32, #tpu.memory_space<vmem>>, %arg3: memref<1x1x8x128xi32, #tpu.memory_space<vmem>>, %arg4: memref<1x3x8x128xf32, #tpu.memory_space<vmem>>) attributes {dimension_semantics = [#tpu.dimension_semantics<parallel>, #tpu.dimension_semantics<arbitrary>], iteration_bounds = array<i64: 2, 1>, scalar_prefetch = 0 : i64, scratch_operands = 0 : i64, tpu.core_type = #tpu.core_type<tc>, window_params = [{transform_indices = @transform_0, window_bounds = array<i64: 1, 4, 8, 128>}, {transform_indices = @transform_1, window_bounds = array<i64: 1, 1, 8, 128>}, {transform_indices = @transform_2, window_bounds = array<i64: 1, 3, 8, 128>}]} {
    %c0_i32 = arith.constant 0 : i32
    %0 = arith.cmpi eq, %arg1, %c0_i32 : i32
    %1 = arith.extui %0 : i1 to i32
    %c0_i32_0 = arith.constant 0 : i32
    %2 = arith.cmpi ne, %1, %c0_i32_0 : i32
    scf.if %2 {
      %cst_45 = arith.constant 0.000000e+00 : f32
      %60 = vector.broadcast %cst_45 : f32 to vector<1x3x8x128xf32>
      %c0_46 = arith.constant 0 : index
      %c0_47 = arith.constant 0 : index
      %c0_48 = arith.constant 0 : index
      %c0_49 = arith.constant 0 : index
      %61 = vector.load %arg4[%c0_46, %c0_47, %c0_48, %c0_49] : memref<1x3x8x128xf32, #tpu.memory_space<vmem>>, vector<1x3x8x128xf32>
      tpu.vector_store %arg4[%c0_46, %c0_47, %c0_48, %c0_49], %60 {strides = array<i32>} : memref<1x3x8x128xf32, #tpu.memory_space<vmem>>, vector<1x3x8x128xf32>,
    } else {
    }
    %c0 = arith.constant 0 : index
    %c0_1 = arith.constant 0 : index
    %c0_2 = arith.constant 0 : index
    %c0_3 = arith.constant 0 : index
    %3 = vector.load %arg3[%c0, %c0_1, %c0_2, %c0_3] : memref<1x1x8x128xi32, #tpu.memory_space<vmem>>, vector<1x1x8x128xi32>
    %4 = vector.shape_cast %3 : vector<1x1x8x128xi32> to vector<8x128xi32>
    %c0_4 = arith.constant 0 : index
    %c0_5 = arith.constant 0 : index
    %c0_6 = arith.constant 0 : index
    %c0_7 = arith.constant 0 : index
    %5 = vector.load %arg2[%c0_4, %c0_5, %c0_6, %c0_7] : memref<1x4x8x128xf32, #tpu.memory_space<vmem>>, vector<1x1x8x128xf32>
    %6 = vector.shape_cast %5 : vector<1x1x8x128xf32> to vector<8x128xf32>
    %c0_i32_8 = arith.constant 0 : i32
    %7 = vector.broadcast %c0_i32_8 : i32 to vector<8x128xi32>
    %c0_9 = arith.constant 0 : index
    %c1 = arith.constant 1 : index
    %c0_10 = arith.constant 0 : index
    %c0_11 = arith.constant 0 : index
    %8 = vector.load %arg2[%c0_9, %c1, %c0_10, %c0_11] : memref<1x4x8x128xf32, #tpu.memory_space<vmem>>, vector<1x1x8x128xf32>
    %9 = vector.shape_cast %8 : vector<1x1x8x128xf32> to vector<8x128xf32>
    %10 = arith.cmpf ogt, %9, %6 : vector<8x128xf32>
    %11 = arith.select %10, %9, %6 : vector<8x128xi1>, vector<8x128xf32>
    %c1_i32 = arith.constant 1 : i32
    %12 = vector.broadcast %c1_i32 : i32 to vector<8x128xi32>
    %13 = arith.select %10, %12, %7 : vector<8x128xi1>, vector<8x128xi32>
    %c0_12 = arith.constant 0 : index
    %c2 = arith.constant 2 : index
    %c0_13 = arith.constant 0 : index
    %c0_14 = arith.constant 0 : index
    %14 = vector.load %arg2[%c0_12, %c2, %c0_13, %c0_14] : memref<1x4x8x128xf32, #tpu.memory_space<vmem>>, vector<1x1x8x128xf32>
    %15 = vector.shape_cast %14 : vector<1x1x8x128xf32> to vector<8x128xf32>
    %16 = arith.cmpf ogt, %15, %11 : vector<8x128xf32>
    %17 = arith.select %16, %15, %11 : vector<8x128xi1>, vector<8x128xf32>
    %c2_i32 = arith.constant 2 : i32
    %18 = vector.broadcast %c2_i32 : i32 to vector<8x128xi32>
    %19 = arith.select %16, %18, %13 : vector<8x128xi1>, vector<8x128xi32>
    %c0_15 = arith.constant 0 : index
    %c3 = arith.constant 3 : index
    %c0_16 = arith.constant 0 : index
    %c0_17 = arith.constant 0 : index
    %20 = vector.load %arg2[%c0_15, %c3, %c0_16, %c0_17] : memref<1x4x8x128xf32, #tpu.memory_space<vmem>>, vector<1x1x8x128xf32>
    %21 = vector.shape_cast %20 : vector<1x1x8x128xf32> to vector<8x128xf32>
    %22 = arith.cmpf ogt, %21, %17 : vector<8x128xf32>
    %c3_i32 = arith.constant 3 : i32
    %23 = vector.broadcast %c3_i32 : i32 to vector<8x128xi32>
    %24 = arith.select %22, %23, %19 : vector<8x128xi1>, vector<8x128xi32>
    %25 = tpu.iota {dimensions = array<i32: 0>} : vector<8x8x128xi32>
    %c1_i32_18 = arith.constant 1 : i32
    %26 = vector.broadcast %c1_i32_18 : i32 to vector<8x8x128xi32>
    %27 = arith.addi %25, %26 : vector<8x8x128xi32>
    %28 = vector.shape_cast %4 : vector<8x128xi32> to vector<1x8x128xi32>
    %29 = vector.broadcast %28 : vector<1x8x128xi32> to vector<8x8x128xi32>
    %30 = arith.cmpi eq, %29, %27 : vector<8x8x128xi32>
    %31 = arith.extui %30 : vector<8x8x128xi1> to vector<8x8x128xi32>
    %32 = arith.sitofp %31 : vector<8x8x128xi32> to vector<8x8x128xf32>
    %33 = vector.shape_cast %24 : vector<8x128xi32> to vector<1x8x128xi32>
    %34 = vector.broadcast %33 : vector<1x8x128xi32> to vector<8x8x128xi32>
    %35 = arith.cmpi eq, %34, %27 : vector<8x8x128xi32>
    %36 = arith.extui %35 : vector<8x8x128xi1> to vector<8x8x128xi32>
    %37 = arith.sitofp %36 : vector<8x8x128xi32> to vector<8x8x128xf32>
    %c0_19 = arith.constant 0 : index
    %c0_20 = arith.constant 0 : index
    %c0_21 = arith.constant 0 : index
    %c0_22 = arith.constant 0 : index
    %38 = vector.load %arg4[%c0_19, %c0_20, %c0_21, %c0_22] : memref<1x3x8x128xf32, #tpu.memory_space<vmem>>, vector<1x1x8x128xf32>
    %39 = vector.shape_cast %38 : vector<1x1x8x128xf32> to vector<8x128xf32>
    %40 = arith.mulf %32, %37 : vector<8x8x128xf32>
    %cst = arith.constant dense<0.000000e+00> : vector<8x128xf32>
    %41 = vector.multi_reduction <add>, %40, %cst [1] : vector<8x8x128xf32> to vector<8x128xf32>
    %42 = arith.addf %39, %41 : vector<8x128xf32>
    %c0_23 = arith.constant 0 : index
    %c0_24 = arith.constant 0 : index
    %c0_25 = arith.constant 0 : index
    %c0_26 = arith.constant 0 : index
    %43 = vector.load %arg4[%c0_23, %c0_24, %c0_25, %c0_26] : memref<1x3x8x128xf32, #tpu.memory_space<vmem>>, vector<1x1x8x128xf32>
    %44 = vector.shape_cast %43 : vector<1x1x8x128xf32> to vector<8x128xf32>
    %45 = vector.shape_cast %42 : vector<8x128xf32> to vector<1x1x8x128xf32>
    tpu.vector_store %arg4[%c0_23, %c0_24, %c0_25, %c0_26], %45 {strides = array<i32>} : memref<1x3x8x128xf32, #tpu.memory_space<vmem>>, vector<1x1x8x128xf32>,
    %c0_27 = arith.constant 0 : index
    %c1_28 = arith.constant 1 : index
    %c0_29 = arith.constant 0 : index
    %c0_30 = arith.constant 0 : index
    %46 = vector.load %arg4[%c0_27, %c1_28, %c0_29, %c0_30] : memref<1x3x8x128xf32, #tpu.memory_space<vmem>>, vector<1x1x8x128xf32>
    %47 = vector.shape_cast %46 : vector<1x1x8x128xf32> to vector<8x128xf32>
    %cst_31 = arith.constant dense<0.000000e+00> : vector<8x128xf32>
    %48 = vector.multi_reduction <add>, %32, %cst_31 [1] : vector<8x8x128xf32> to vector<8x128xf32>
    %49 = arith.addf %47, %48 : vector<8x128xf32>
    %c0_32 = arith.constant 0 : index
    %c1_33 = arith.constant 1 : index
    %c0_34 = arith.constant 0 : index
    %c0_35 = arith.constant 0 : index
    %50 = vector.load %arg4[%c0_32, %c1_33, %c0_34, %c0_35] : memref<1x3x8x128xf32, #tpu.memory_space<vmem>>, vector<1x1x8x128xf32>
    %51 = vector.shape_cast %50 : vector<1x1x8x128xf32> to vector<8x128xf32>
    %52 = vector.shape_cast %49 : vector<8x128xf32> to vector<1x1x8x128xf32>
    tpu.vector_store %arg4[%c0_32, %c1_33, %c0_34, %c0_35], %52 {strides = array<i32>} : memref<1x3x8x128xf32, #tpu.memory_space<vmem>>, vector<1x1x8x128xf32>,
    %c0_36 = arith.constant 0 : index
    %c2_37 = arith.constant 2 : index
    %c0_38 = arith.constant 0 : index
    %c0_39 = arith.constant 0 : index
    %53 = vector.load %arg4[%c0_36, %c2_37, %c0_38, %c0_39] : memref<1x3x8x128xf32, #tpu.memory_space<vmem>>, vector<1x1x8x128xf32>
    %54 = vector.shape_cast %53 : vector<1x1x8x128xf32> to vector<8x128xf32>
    %cst_40 = arith.constant dense<0.000000e+00> : vector<8x128xf32>
    %55 = vector.multi_reduction <add>, %37, %cst_40 [1] : vector<8x8x128xf32> to vector<8x128xf32>
    %56 = arith.addf %54, %55 : vector<8x128xf32>
    %c0_41 = arith.constant 0 : index
    %c2_42 = arith.constant 2 : index
    %c0_43 = arith.constant 0 : index
    %c0_44 = arith.constant 0 : index
    %57 = vector.load %arg4[%c0_41, %c2_42, %c0_43, %c0_44] : memref<1x3x8x128xf32, #tpu.memory_space<vmem>>, vector<1x1x8x128xf32>
    %58 = vector.shape_cast %57 : vector<1x1x8x128xf32> to vector<8x128xf32>
    %59 = vector.shape_cast %56 : vector<8x128xf32> to vector<1x1x8x128xf32>
    tpu.vector_store %arg4[%c0_41, %c2_42, %c0_43, %c0_44], %59 {strides = array<i32>} : memref<1x3x8x128xf32, #tpu.memory_space<vmem>>, vector<1x1x8x128xf32>,
    return
  }
  func.func @transform_0(%arg0: i32, %arg1: i32) -> (i32, i32, i32, i32) {
    %c0_i32 = arith.constant 0 : i32
    %c0_i32_0 = arith.constant 0 : i32
    %c0_i32_1 = arith.constant 0 : i32
    return %arg0, %c0_i32, %arg1, %c0_i32_0 : i32, i32, i32, i32
  }
  func.func @transform_1(%arg0: i32, %arg1: i32) -> (i32, i32, i32, i32) {
    %c0_i32 = arith.constant 0 : i32
    %c0_i32_0 = arith.constant 0 : i32
    %c0_i32_1 = arith.constant 0 : i32
    return %arg0, %c0_i32, %arg1, %c0_i32_0 : i32, i32, i32, i32
  }
  func.func @transform_2(%arg0: i32, %arg1: i32) -> (i32, i32, i32, i32) {
    %c0_i32 = arith.constant 0 : i32
    %c0_i32_0 = arith.constant 0 : i32
    %c0_i32_1 = arith.constant 0 : i32
    %c0_i32_2 = arith.constant 0 : i32
    return %arg0, %c0_i32, %c0_i32_0, %c0_i32_1 : i32, i32, i32, i32
  }
}

</mosaic_0001>

<bundles_post_ra>
// kernel: tpu_custom_call.1
= control target key start
LH: loop header
LB: loop body
LE: loop exit
PB: predicated region body
PF: predicated region fallthrough
CT: control target
= control target key end

     0   :  { %7 = vsyncpa [#allocation3], 0  ;;  %s1165_s0 = inlined_call_operand.hbm [shape: f32[2,4,8,128], index: 0, kind: input, shape index: {}]   ;;  %s1166_s1 = inlined_call_operand.hbm [shape: s32[2,1,8,128], index: 1, kind: input, shape index: {}]   ;;  %s1167_s2 = inlined_call_operand.hbm [shape: f32[2,3,8,128], index: 2, kind: output, shape index: {}]  }
   0x1   :  { %9 = vsyncpa [#allocation3 + $0x1], 0 }
   0x2   :  { %10 = vsyncpa [#allocation6], 0 }
   0x3   :  { %12 = vsyncpa [#allocation6 + $0x1], 0 }
   0x4   :  { %13 = vsyncpa [#allocation4], 0 }
   0x5   :  { %15 = vsyncpa [#allocation4 + $0x1], 0  ;;  %s916_s9 = smov 0   ;;  %s918_s10 = smov 0  }
   0x6   :  { %s920_s11 = smov 0   ;;  %s922_s12 = smov 0  }
   0x7   :  { %s924_s13 = smov 0   ;;  %s926_s14 = smov 0  }
   0x8 LB: > { %s633_s15 = sadd.s32 4294967295, %s893_s14   ;;  %s634_s16 = sadd.s32 4294967294, %s893_s14   ;;  %s893_s14 = sphi %s926_s14, %s21_s14   ;;  %s889_s13 = sphi %s924_s13, %s1177_s13   ;;  %s885_s12 = sphi %s922_s12, %s1176_s12   ;;  %s881_s11 = sphi %s920_s11, %s1175_s11   ;;  %s877_s10 = sphi %s918_s10, %s1174_s10   ;;  %s873_s9 = sphi %s916_s9, %s1173_s9  }
   0x9   : > { %s33_s17 = sadd.s32 1, %s889_s13  ;;  %s42_s18 = sadd.s32 1, %s881_s11 }
   0xa   : > { %p35_p0 = scmp.ge.s32.totalorder %s33_s17, 2  ;;  %p49_p1 = scmp.ne.s32.totalorder %s881_s11, %s877_s10 }
   0xb   : > { %p50_p2 = scmp.eq.s32.totalorder %s893_s14, 0  ;;  %p55_p3 = scmp.ne.s32.totalorder %s877_s10, %s873_s9 }
   0xc   : > { %s1179_s17 = smov (%p35_p0, %s33_s17), 0  ;;  %p56_p5 = scmp.eq.s32.totalorder %s633_s15, 0 }
   0xd   : > { %p957_p4 = por %p50_p2, %p49_p1  ;;  %s37_s20 = ssub.s32 %s889_s13, %s1179_s17 }
   0xe   : > { %p107_p6 = scmp.eq.s32.totalorder %s633_s15, 1  ;;  %p40_p7 = scmp.eq.s32.totalorder %s37_s20, 0 }
   0xf   : > { %p963_p8 = por %p56_p5, %p55_p3  ;;  %p113_p10 = scmp.eq.s32.totalorder %s634_s16, 1 }
  0x10   : > { %p967_p9 = por %p107_p6, %p49_p1  ;;  %p636_p12 = scmp.ge.s32.totalorder %s893_s14, 2 }
  0x11   : > { %s972_s23 = scalar_select %p40_p7, %s881_s11, %s42_s18  }
  0x12   : > { %p974_p11 = por %p113_p10, %p55_p3  ;;  %p691_p13 = scmp.lt.s32.totalorder %s893_s14, 2 }
  0x13   : > { %s133_s25 = sand.u32 1, %s881_s11   ;;  %s671_s27 = sshll.u32 %s889_s13, 5 }
  0x14   : > { %s637_s26 = sshll.u32 %s133_s25, 5  ;;  %s143_s30 = scalar_lea.hbm %s1165_s0, %s671_s27 }
  0x15   : > { %s137_s3 = scalar_lea.vmem [#allocation2], %s637_s26  ;;  %s144_s5 = sshll.u32 %s143_s30, 4  ;;  %s145_s5 = int_to_ptr.hbm [resolvable:$true] %s144_s5 }
  0x16   : > { %s146_s4 = sshll.u32 %s137_s3, 4  ;;  %p987_p0 = pnand %p691_p13, %p957_p4  ;;  %s147_s4 = int_to_ptr.vmem [resolvable:$true] %s146_s4 }
  0x17   : > { %p642_p1 = scmp.ge.s32.totalorder %s893_s14, 1  ;;  %s134_s7 = scalar_lea.sflag [#allocation3], %s133_s25 }
  0x18   : > { %s895_s8 = smov 128   ;;  %s896_s15 = smov 8  }
  0x19   : > { %683 = dma.hbm_to_vmem [thread:$0]  (!%p987_p0), %s145_s5, 512, %s147_s4, %s134_s7, %s895_s8, %s895_s8, %s896_s15  }
  0x1a   : > { %p174_p2 = scmp.lt.s32.totalorder %s893_s14, 3  ;;  %s640_s16 = sshll.u32 %s133_s25, 3 }
  0x1b   : > { %s641_s18 = sshll.u32 %s889_s13, 3  ;;  %s160_s27 = scalar_lea.vmem [#allocation5], %s640_s16 }
  0x1c   : > { %p175_p3 = pnand %p642_p1, %p174_p2  ;;  %s165_s19 = scalar_lea.hbm %s1166_s1, %s641_s18 }
  0x1d   : > { %s169_s28 = sshll.u32 %s160_s27, 4  ;;  %s167_s29 = sshll.u32 %s165_s19, 4  ;;  %s170_s28 = int_to_ptr.vmem [resolvable:$true] %s169_s28  ;;  %s168_s29 = int_to_ptr.hbm [resolvable:$true] %s167_s29 }
  0x1e   : > { %s157_s30 = scalar_lea.sflag [#allocation6], %s133_s25  ;;  %178 = sbr.rel (%p175_p3) target bundleno = 105 (0x69), region = 28 }
  0x1f   : > { %686 = dma.hbm_to_vmem [thread:$0]  (!%p987_p0), %s168_s29, 128, %s170_s28, %s157_s30  }
  0x20   : > { %s1002_s3 = sand.u32 (!%p175_p3), 1, %s877_s10  }
  0x21   : > { %s643_s4 = sshll.u32 (!%p175_p3), %s1002_s3, 5  ;;  %s181_s5 = scalar_lea.sflag (!%p175_p3), [#allocation3], %s1002_s3 }
  0x22   : > { %s184_s7 = scalar_lea.vmem (!%p175_p3), [#allocation2], %s643_s4 }
  0x23   : > { %860 = dma.done.wait (%p963_p8), %s181_s5, 512  }
  0x24   : > { %862 = vsyncadd (%p963_p8), %s181_s5, 4294966784  ;;  %s644_s25 = sshll.u32 %s1002_s3, 3  ;;  %s191_s6 = scalar_lea.sflag [#allocation6], %s1002_s3 }
  0x25   : > { %s194_s8 = scalar_lea.vmem [#allocation5], %s644_s25 }
  0x26   : > { %864 = dma.done.wait (%p963_p8), %s191_s6, 128  }
  0x27   : > { %866 = vsyncadd (%p963_p8), %s191_s6, 4294967168  ;;  %v228_v0 = vld [vmem:[%s194_s8] sm:$0xff]  ;;  %v646_v3 = vld [vmem:[%s184_s7 + $0x10] sm:$0xff]  ;;  %v897_v5 = vmov 0   ;;  %v898_v10 = vmov 0.0   ;;  %s672_s21 = smul.u32 24, %s1002_s3 }
  0x28   : > { %v229_v1 = vld [vmem:[%s184_s7] sm:$0xff]  ;;  %v645_v2 = vld [vmem:[%s184_s7 + $0x8] sm:$0xff]  ;;  %vm244_vm1 = vcmp.eq.s32.totalorder %v228_v0, 1  ;;  %vm245_vm2 = vcmp.eq.s32.totalorder %v228_v0, 2  ;;  %vm246_vm3 = vcmp.eq.s32.totalorder %v228_v0, 3  ;;  %v647_v7 = vld [vmem:[%s184_s7 + $0x18] sm:$0xff] }
  0x29   : > { %vm232_vm0 = vcmp.gt.f32.partialorder %v645_v2, %v229_v1  ;;  %vm247_vm4 = vcmp.eq.s32.totalorder %v228_v0, 4  ;;  %vm248_vm5 = vcmp.eq.s32.totalorder %v228_v0, 5  ;;  %vm249_vm7 = vcmp.eq.s32.totalorder %v228_v0, 6  ;;  %s1088_s15 = scalar_lea.vmem [#allocation7], %s672_s21  ;;  %s673_s16 = smul.u32 24, %s885_s12 }
  0x2a   : > { %v233_v4 = vsel %vm232_vm0, %v645_v2, %v229_v1  ;;  %v234_v6 = vsel %vm232_vm0, 1, %v897_v5  ;;  %vm250_vm8 = vcmp.eq.s32.totalorder %v228_v0, 7  ;;  %vm251_vm9 = vcmp.eq.s32.totalorder %v228_v0, 8  ;;  %s523_s19 = sshll.u32 %s1088_s15, 4  ;;  %s511_s27 = scalar_lea.sflag [#allocation4], %s1002_s3  ;;  %s524_s19 = int_to_ptr.vmem [resolvable:$true] %s523_s19 }
  0x2b   : > { %vm237_vm6 = vcmp.gt.f32.partialorder %v646_v3, %v233_v4  ;;  %v1017_v11 = vsel %vm244_vm1, 1.0, %v898_v10  ;;  %v1020_v12 = vsel %vm245_vm2, 1.0, %v898_v10  ;;  %v1023_v13 = vsel %vm246_vm3, 1.0, %v898_v10  ;;  %s522_s26 = scalar_lea.hbm %s1167_s2, %s673_s16  ;;  %s827_s5 = scalar_lea.hbm %s1167_s2, 48 }
  0x2c   : > { %v238_v8 = vsel %vm237_vm6, %v646_v3, %v233_v4  ;;  %v239_v9 = vsel %vm237_vm6, 2, %v234_v6  ;;  %v1025_v14 = vsel %vm247_vm4, 1.0, %v898_v10  ;;  %v1027_v15 = vsel %vm248_vm5, 1.0, %v898_v10  ;;  %s525_s12 = sshll.u32 %s522_s26, 4  ;;  %s526_s12 = int_to_ptr.hbm [resolvable:$true] %s525_s12 }
  0x2d   : > { %vm242_vm10 = vcmp.gt.f32.partialorder %v647_v7, %v238_v8  ;;  %v1029_v17 = vsel %vm249_vm7, 1.0, %v898_v10  ;;  %v1031_v18 = vsel %vm250_vm8, 1.0, %v898_v10  ;;  %v1033_v19 = vsel %vm251_vm9, 1.0, %v898_v10  ;;  %s821_s28 = sshra.s32 %s526_s12, 4  ;;  %s822_s28 = int_to_ptr.hbm [resolvable:$true] %s821_s28 }
  0x2e   : > { %v243_v16 = vsel %vm242_vm10, 3, %v239_v9  ;;  %vm357_vm3 = vcmask 1041409   ;;  %vm359_vm4 = vcmask 1042434   ;;  %vm361_vm5 = vcmask 1043459   ;;  %s823_s29 = scalar_lea.hbm %s822_s28, 24  ;;  %p828_p7 = scmp.lt.s32.totalorder %s822_s28, %s1167_s2 }
  0x2f   : > { %vm268_vm11 = vcmp.eq.s32.totalorder %v243_v16, 1  ;;  %vm269_vm12 = vcmp.eq.s32.totalorder %v243_v16, 2  ;;  %vm270_vm13 = vcmp.eq.s32.totalorder %v243_v16, 3  ;;  %vm271_vm14 = vcmp.eq.s32.totalorder %v243_v16, 4  ;;  %p824_p4 = scmp.ne.s32.totalorder %s822_s28, %s823_s29  ;;  %p829_p8 = scmp.lt.s32.totalorder %s827_s5, %s823_s29 }
  0x30   : > { %vm272_vm15 = vcmp.eq.s32.totalorder %v243_v16, 5  ;;  %vm273_vm0 = vcmp.eq.s32.totalorder %v243_v16, 6  ;;  %vm274_vm1 = vcmp.eq.s32.totalorder %v243_v16, 7  ;;  %vm275_vm2 = vcmp.eq.s32.totalorder %v243_v16, 8 }
  0x31   : > { %v1035_v20 = vsel %vm268_vm11, 1.0, %v898_v10  ;;  %v1037_v21 = vsel %vm269_vm12, 1.0, %v898_v10  ;;  %v1039_v22 = vsel %vm270_vm13, 1.0, %v898_v10  ;;  %v1041_v23 = vsel %vm271_vm14, 1.0, %v898_v10  ;;  %p825_p5 = pnand %p824_p4, %p967_p9  ;;  %p830_p10 = por %p829_p8, %p828_p7 }
  0x32   : > { %v1043_v24 = vsel %vm272_vm15, 1.0, %v898_v10  ;;  %v1045_v25 = vsel %vm273_vm0, 1.0, %v898_v10  ;;  %v1047_v26 = vsel %vm274_vm1, 1.0, %v898_v10  ;;  %v1049_v27 = vsel %vm275_vm2, 1.0, %v898_v10 }
  0x33   : > { %v293_v28 = vmul.f32 %v1035_v20, %v1017_v11  ;;  %v294_v29 = vmul.f32 %v1037_v21, %v1020_v12  ;;  %v295_v30 = vmul.f32 %v1039_v22, %v1023_v13  ;;  %v296_v31 = vmul.f32 %v1041_v23, %v1025_v14  ;;  %p826_p6 = pneg %p825_p5 }
  0x34   : > { %v297_v32 = vmul.f32 %v1043_v24, %v1027_v15  ;;  %v298_v33 = vmul.f32 %v1045_v25, %v1029_v17  ;;  %v299_v34 = vmul.f32 %v1047_v26, %v1031_v18  ;;  %v300_v35 = vmul.f32 %v1049_v27, %v1033_v19 }
  0x35   : > { %v301_v36 = vrot.slane %v293_v28, 4  ;;  %v307_v37 = vrot.slane %v294_v29, 4  ;;  %v313_v38 = vrot.slane %v295_v30, 4  ;;  %v319_v39 = vrot.slane %v296_v31, 4  ;;  %p831_p13 = pnand %p830_p10, %p826_p6 }
  0x36   : > { %v325_v40 = vrot.slane %v297_v32, 4  ;;  %v331_v41 = vrot.slane %v298_v33, 4  ;;  %v337_v42 = vrot.slane %v299_v34, 4  ;;  %v343_v43 = vrot.slane %v300_v35, 4 }
  0x37   : > { %v302_v44 = vadd.f32 %v301_v36, %v293_v28  ;;  %v308_v45 = vadd.f32 %v307_v37, %v294_v29  ;;  %v314_v46 = vadd.f32 %v313_v38, %v295_v30  ;;  %v320_v47 = vadd.f32 %v319_v39, %v296_v31 }
  0x38   : > { %v326_v48 = vadd.f32 %v325_v40, %v297_v32  ;;  %v332_v49 = vadd.f32 %v331_v41, %v298_v33  ;;  %v338_v50 = vadd.f32 %v337_v42, %v299_v34  ;;  %v344_v51 = vadd.f32 %v343_v43, %v300_v35 }
  0x39   : > { %v303_v52 = vrot.slane %v302_v44, 2  ;;  %v309_v53 = vrot.slane %v308_v45, 2  ;;  %v315_v54 = vrot.slane %v314_v46, 2  ;;  %v321_v55 = vrot.slane %v320_v47, 2 }
  0x3a   : > { %vm363_vm6 = vcmask 1044484   ;;  %v327_v56 = vrot.slane %v326_v48, 2  ;;  %v333_v57 = vrot.slane %v332_v49, 2  ;;  %v339_v58 = vrot.slane %v338_v50, 2 }
  0x3b   : > { %v345_v59 = vrot.slane %v344_v51, 2  ;;  %vm365_vm7 = vcmask 1045509   ;;  %v304_v60 = vadd.f32 %v303_v52, %v302_v44  ;;  %v310_v61 = vadd.f32 %v309_v53, %v308_v45 }
  0x3c   : > { %v316_v62 = vadd.f32 %v315_v54, %v314_v46  ;;  %v322_v63 = vadd.f32 %v321_v55, %v320_v47  ;;  %vm367_vm8 = vcmask 1046534   ;;  %v328_v0 = vadd.f32 %v327_v56, %v326_v48 }
  0x3d   : > { %v334_v1 = vadd.f32 %v333_v57, %v332_v49  ;;  %v340_v2 = vadd.f32 %v339_v58, %v338_v50  ;;  %v346_v3 = vadd.f32 %v345_v59, %v344_v51  ;;  %vm369_vm9 = vcmask 1047559  }
  0x3e   : > { %v305_v4 = vrot.slane %v304_v60, 1  ;;  %v311_v5 = vrot.slane %v310_v61, 1  ;;  %v317_v6 = vrot.slane %v316_v62, 1  ;;  %v323_v7 = vrot.slane %v322_v63, 1 }
  0x3f   : > { %v329_v8 = vrot.slane %v328_v0, 1  ;;  %v335_v9 = vrot.slane %v334_v1, 1  ;;  %v341_v10 = vrot.slane %v340_v2, 1  ;;  %v347_v16 = vrot.slane %v346_v3, 1 }
  0x40   : > { %v306_v28 = vadd.f32 %v305_v4, %v304_v60  ;;  %v312_v29 = vadd.f32 %v311_v5, %v310_v61  ;;  %v318_v30 = vadd.f32 %v317_v6, %v316_v62  ;;  %v324_v31 = vadd.f32 %v323_v7, %v322_v63 }
  0x41   : > { %v330_v32 = vadd.f32 %v329_v8, %v328_v0  ;;  %v336_v33 = vadd.f32 %v335_v9, %v334_v1  ;;  %v342_v34 = vadd.f32 %v341_v10, %v340_v2  ;;  %v348_v35 = vadd.f32 %v347_v16, %v346_v3 }
  0x42   : > { %v358_v36 = vsel %vm357_vm3, %v312_v29, %v306_v28  ;;  %v376_v37 = vrot.slane %v1017_v11, 4  ;;  %v382_v38 = vrot.slane %v1020_v12, 4  ;;  %v388_v39 = vrot.slane %v1023_v13, 4 }
  0x43   : > { %v360_v40 = vsel %vm359_vm4, %v318_v30, %v358_v36  ;;  %v394_v41 = vrot.slane %v1025_v14, 4  ;;  %v400_v42 = vrot.slane %v1027_v15, 4  ;;  %v406_v43 = vrot.slane %v1029_v17, 4 }
  0x44   : > { %v362_v44 = vsel %vm361_vm5, %v324_v31, %v360_v40  ;;  %v377_v45 = vadd.f32 %v1017_v11, %v376_v37  ;;  %v383_v46 = vadd.f32 %v1020_v12, %v382_v38  ;;  %v389_v47 = vadd.f32 %v1023_v13, %v388_v39 }
  0x45   : > { %v364_v48 = vsel %vm363_vm6, %v330_v32, %v362_v44  ;;  %v395_v49 = vadd.f32 %v1025_v14, %v394_v41  ;;  %v401_v50 = vadd.f32 %v1027_v15, %v400_v42  ;;  %v407_v51 = vadd.f32 %v1029_v17, %v406_v43 }
  0x46   : > { %v366_v52 = vsel %vm365_vm7, %v336_v33, %v364_v48  ;;  %v378_v53 = vrot.slane %v377_v45, 2  ;;  %v384_v54 = vrot.slane %v383_v46, 2  ;;  %v390_v55 = vrot.slane %v389_v47, 2 }
  0x47   : > { %v368_v56 = vsel %vm367_vm8, %v342_v34, %v366_v52  ;;  %v396_v11 = vrot.slane %v395_v49, 2  ;;  %v402_v57 = vrot.slane %v401_v50, 2  ;;  %v408_v12 = vrot.slane %v407_v51, 2 }
  0x48   : > { %v370_v13 = vsel %vm369_vm9, %v348_v35, %v368_v56  ;;  %v379_v58 = vadd.f32 %v378_v53, %v377_v45  ;;  %v385_v59 = vadd.f32 %v384_v54, %v383_v46  ;;  %v391_v60 = vadd.f32 %v390_v55, %v389_v47 }
  0x49   : > { %v397_v14 = vadd.f32 %v396_v11, %v395_v49  ;;  %v403_v61 = vadd.f32 %v402_v57, %v401_v50  ;;  %v409_v15 = vadd.f32 %v408_v12, %v407_v51  ;;  %v412_v0 = vrot.slane %v1031_v18, 4  ;;  %373 = vst [vmem:[%s1088_s15] sm:$0xff] %v370_v13 }
  0x4a   : > { %v380_v62 = vrot.slane %v379_v58, 1  ;;  %v386_v17 = vrot.slane %v385_v59, 1  ;;  %v392_v63 = vrot.slane %v391_v60, 1  ;;  %v418_v4 = vrot.slane %v1033_v19, 4 }
  0x4b   : > { %v398_v1 = vrot.slane %v397_v14, 1  ;;  %v404_v2 = vrot.slane %v403_v61, 1  ;;  %v410_v3 = vrot.slane %v409_v15, 1  ;;  %v413_v8 = vadd.f32 %v1031_v18, %v412_v0 }
  0x4c   : > { %v381_v5 = vadd.f32 %v380_v62, %v379_v58  ;;  %v387_v6 = vadd.f32 %v386_v17, %v385_v59  ;;  %v393_v7 = vadd.f32 %v392_v63, %v391_v60  ;;  %v419_v28 = vadd.f32 %v1033_v19, %v418_v4 }
  0x4d   : > { %v399_v9 = vadd.f32 %v398_v1, %v397_v14  ;;  %v405_v10 = vadd.f32 %v404_v2, %v403_v61  ;;  %v411_v16 = vadd.f32 %v410_v3, %v409_v15  ;;  %v414_v29 = vrot.slane %v413_v8, 2 }
  0x4e   : > { %v432_v30 = vsel %vm357_vm3, %v387_v6, %v381_v5  ;;  %v444_v31 = vrot.slane %v1035_v20, 4  ;;  %v450_v32 = vrot.slane %v1037_v21, 4  ;;  %v420_v33 = vrot.slane %v419_v28, 2 }
  0x4f   : > { %v433_v34 = vsel %vm359_vm4, %v393_v7, %v432_v30  ;;  %v456_v35 = vrot.slane %v1039_v22, 4  ;;  %v462_v36 = vrot.slane %v1041_v23, 4  ;;  %v415_v18 = vadd.f32 %v414_v29, %v413_v8 }
  0x50   : > { %v434_v37 = vsel %vm361_vm5, %v399_v9, %v433_v34  ;;  %v445_v38 = vadd.f32 %v1035_v20, %v444_v31  ;;  %v451_v19 = vadd.f32 %v1037_v21, %v450_v32  ;;  %v421_v39 = vadd.f32 %v420_v33, %v419_v28 }
  0x51   : > { %v435_v40 = vsel %vm363_vm6, %v405_v10, %v434_v37  ;;  %v457_v41 = vadd.f32 %v1039_v22, %v456_v35  ;;  %v463_v42 = vadd.f32 %v1041_v23, %v462_v36  ;;  %v416_v43 = vrot.slane %v415_v18, 1 }
  0x52   : > { %v436_v44 = vsel %vm365_vm7, %v411_v16, %v435_v40  ;;  %v446_v45 = vrot.slane %v445_v38, 2  ;;  %v452_v46 = vrot.slane %v451_v19, 2  ;;  %v422_v47 = vrot.slane %v421_v39, 1 }
  0x53   : > { %v458_v48 = vrot.slane %v457_v41, 2  ;;  %v464_v49 = vrot.slane %v463_v42, 2  ;;  %v468_v50 = vrot.slane %v1043_v24, 4  ;;  %v417_v20 = vadd.f32 %v416_v43, %v415_v18 }
  0x54   : > { %v447_v51 = vadd.f32 %v446_v45, %v445_v38  ;;  %v453_v21 = vadd.f32 %v452_v46, %v451_v19  ;;  %v474_v52 = vrot.slane %v1045_v25, 4  ;;  %v423_v53 = vadd.f32 %v422_v47, %v421_v39 }
  0x55   : > { %v459_v54 = vadd.f32 %v458_v48, %v457_v41  ;;  %v465_v22 = vadd.f32 %v464_v49, %v463_v42  ;;  %v469_v23 = vadd.f32 %v1043_v24, %v468_v50  ;;  %v437_v55 = vsel %vm367_vm8, %v417_v20, %v436_v44 }
  0x56   : > { %v448_v56 = vrot.slane %v447_v51, 1  ;;  %v454_v11 = vrot.slane %v453_v21, 1  ;;  %v475_v57 = vadd.f32 %v1045_v25, %v474_v52  ;;  %v438_v12 = vsel %vm369_vm9, %v423_v53, %v437_v55 }
  0x57   : > { %v460_v13 = vrot.slane %v459_v54, 1  ;;  %v466_v58 = vrot.slane %v465_v22, 1  ;;  %v470_v59 = vrot.slane %v469_v23, 2  ;;  %v480_v24 = vrot.slane %v1047_v26, 4  ;;  %665 = vst [vmem:[%s1088_s15 + $0x8] sm:$0xff] %v438_v12 }
  0x58   : > { %v449_v60 = vadd.f32 %v448_v56, %v447_v51  ;;  %v455_v14 = vadd.f32 %v454_v11, %v453_v21  ;;  %v476_v61 = vrot.slane %v475_v57, 2  ;;  %v486_v0 = vrot.slane %v1049_v27, 4 }
  0x59   : > { %v461_v15 = vadd.f32 %v460_v13, %v459_v54  ;;  %v467_v62 = vadd.f32 %v466_v58, %v465_v22  ;;  %v471_v17 = vadd.f32 %v470_v59, %v469_v23  ;;  %v481_v2 = vadd.f32 %v1047_v26, %v480_v24 }
  0x5a   : > { %v477_v63 = vadd.f32 %v476_v61, %v475_v57  ;;  %v500_v25 = vsel %vm357_vm3, %v455_v14, %v449_v60  ;;  %v487_v5 = vadd.f32 %v1049_v27, %v486_v0 }
  0x5b   : > { %v472_v1 = vrot.slane %v471_v17, 1  ;;  %v501_v3 = vsel %vm359_vm4, %v461_v15, %v500_v25  ;;  %v482_v8 = vrot.slane %v481_v2, 2 }
  0x5c   : > { %v478_v4 = vrot.slane %v477_v63, 1  ;;  %v502_v6 = vsel %vm361_vm5, %v467_v62, %v501_v3  ;;  %v488_v10 = vrot.slane %v487_v5, 2 }
  0x5d   : > { %v473_v7 = vadd.f32 %v472_v1, %v471_v17  ;;  %v483_v16 = vadd.f32 %v482_v8, %v481_v2 }
  0x5e   : > { %v479_v9 = vadd.f32 %v478_v4, %v477_v63  ;;  %v489_v29 = vadd.f32 %v488_v10, %v487_v5 }
  0x5f   : > { %v503_v28 = vsel %vm363_vm6, %v473_v7, %v502_v6  ;;  %v484_v26 = vrot.slane %v483_v16, 1 }
  0x60   : > { %v490_v30 = vrot.slane %v489_v29, 1  ;;  %v504_v27 = vsel %vm365_vm7, %v479_v9, %v503_v28 }
  0x61   : > { %v485_v31 = vadd.f32 %v484_v26, %v483_v16 }
  0x62   : > { %v491_v32 = vadd.f32 %v490_v30, %v489_v29 }
  0x63   : > { %v505_v33 = vsel %vm367_vm8, %v485_v31, %v504_v27 }
  0x64   : > { %v506_v34 = vsel %vm369_vm9, %v491_v32, %v505_v33 }
  0x65   : > { %667 = vst [vmem:[%s1088_s15 + $0x10] sm:$0xff] %v506_v34 }
  0x66   : > { %834 = shalt.err (!%p831_p13)
}
  0x67   : > { %s899_s3 = smov 128   ;;  %s900_s6 = smov 8  }
  0x68   : > { %678 = dma.vmem_to_hbm [thread:$0]  (%p967_p9), %s524_s19, 384, %s526_s12, %s511_s27, %s899_s3, %s899_s3, %s900_s6  }
  0x69 PF: > { %s540_s8 = sand.u32 1, %s873_s9   ;;  %p688_p0 = pnand %p636_p12, %p974_p11 }
  0x6a   : > { %s541_s21 = scalar_lea.sflag [#allocation4], %s540_s8 }
  0x6b   : > { %p689_p1 = pneg %p688_p0 }
  0x6d   : > { %868 = dma.done.wait (%p689_p1), %s541_s21, 384  }
  0x6e   : > { %870 = vsyncadd (%p689_p1), %s541_s21, 4294966912  ;;  %s21_s14 = sadd.s32 1, %s893_s14   ;;  %s1173_s9 = smov %s877_s10 }
  0x6f   : > { %p18_p2 = scmp.ge.s32.totalorder %s21_s14, 4   ;;  %s1174_s10 = smov %s881_s11 }
  0x70   : > { %s1175_s11 = smov %s972_s23  ;;  %s1176_s12 = smov %s889_s13 }
  0x71   : > { %s1177_s13 = smov %s1179_s17  ;;  %20 = sbr.rel (!%p18_p2) target bundleno = 8 (0x8), region = 95 }
  0x76   :  { %547 = vsyncpa [#allocation3], 1 }
  0x77   :  { %549 = vsyncpa [#allocation3 + $0x1], 1 }
  0x78   :  { %550 = vsyncpa [#allocation6], 1 }
  0x79   :  { %552 = vsyncpa [#allocation6 + $0x1], 1 }
  0x7a   :  { %553 = vsyncpa [#allocation4], 1 }
  0x7b   :  { %555 = vsyncpa [#allocation4 + $0x1], 1 }

</bundles_post_ra>
